<compile_context>
chip_gen: v5e
topology: v5e:2x2
jax: 0.10.0
libtpu: 0.0.40
codegen_flags: <defaults>
</compile_context>

<pallas_src>
import jax
import jax.numpy as jnp
from jax.experimental import pallas as pl
from jax.experimental.pallas import tpu as pltpu

SUBLANE = 8  # f32 sublane multiple


def _round_up(n, m):
    return ((n + m - 1) // m) * m


def linear_kernel(x_ref, w_ref, b_ref, o_ref):
    # x_ref: (TB, in_f), w_ref: (in_f, out_f), b_ref: (1, out_f), o_ref: (TB, out_f)
    acc = jnp.dot(x_ref[...], w_ref[...], preferred_element_type=jnp.float32)
    o_ref[...] = (acc + b_ref[...]).astype(o_ref.dtype)


def prepare_params(weight, bias):
    """One-time parameter prep.

    weight: (out_f, in_f) PyTorch layout, bias: (out_f,).
    Returns (w_t (in_f, out_f), b (1, out_f)). No lane padding: the kernel
    emits the true out_f-wide output (smaller HBM writeback wins here).
    """
    w_t = jnp.asarray(weight).T               # (in_f, out_f)
    b_row = jnp.asarray(bias).reshape(1, -1)  # (1, out_f)
    return w_t, b_row


def bank_model_bob_forward(x, w_t, b_row, *, batch_tile=1024):
    """x: (B, in_f) f32. Returns (B, out_f) = x @ W.T + b."""
    B, in_f = x.shape
    out_f = w_t.shape[1]

    if B == 0:  # guard: avoid zero-size tile / divide-by-zero
        return jnp.zeros((0, out_f), x.dtype)

    # Batch tile: multiple of the f32 sublane (8), targeting >= 2 grid steps so
    # dual-TensorCore chips (v7x) get work, capped at `batch_tile`.
    tb = min(_round_up(batch_tile, SUBLANE), _round_up(pl.cdiv(B, 2), SUBLANE))
    grid = (pl.cdiv(B, tb),)  # cdiv grid: no batch zero-pad pass needed

    return pl.pallas_call(
        linear_kernel,
        out_shape=jax.ShapeDtypeStruct((B, out_f), x.dtype),
        grid=grid,
        in_specs=[
            pl.BlockSpec((tb, in_f), lambda i: (i, 0)),     # x: tiled over batch
            pl.BlockSpec((in_f, out_f), lambda i: (0, 0)),  # W: VMEM-resident
            pl.BlockSpec((1, out_f), lambda i: (0, 0)),     # b: VMEM-resident
        ],
        out_specs=pl.BlockSpec((tb, out_f), lambda i: (i, 0)),
        compiler_params=pltpu.CompilerParams(
            dimension_semantics=("parallel",),              # megacore / v7x 2-TC sharding
        ),
    )(x, w_t, b_row)


if __name__ == "__main__":
    key = jax.random.PRNGKey(0)
    k_x1, k_x2, k_x3, k_w, k_b = jax.random.split(key, 5)

    IN, OUT = 12, 30

    # Deterministic parameter init mimicking nn.Linear default:
    # uniform(-1/sqrt(in_features), 1/sqrt(in_features))
    bound = 1.0 / jnp.sqrt(jnp.float32(IN))
    weight = jax.random.uniform(k_w, (OUT, IN), jnp.float32, -bound, bound)
    bias = jax.random.uniform(k_b, (OUT,), jnp.float32, -bound, bound)

    # Prepare params once (transpose only; reused across calls).
    w_t, b_row = prepare_params(weight, bias)

    # Case 1: small batch, single grid step.
    B1 = 8
    x1 = jax.random.normal(k_x1, (B1, IN), jnp.float32)
    out1 = jax.block_until_ready(bank_model_bob_forward(x1, w_t, b_row))
    ref1 = x1 @ weight.T + bias
    assert out1.shape == (B1, OUT), out1.shape
    assert jnp.allclose(out1, ref1, atol=1e-5, rtol=1e-5), "mismatch vs reference (B=8)"

    # Case 2: multi-tile grid path (small tile to exercise the batch grid).
    B2 = 24
    x2 = jax.random.normal(k_x2, (B2, IN), jnp.float32)
    out2 = jax.block_until_ready(
        bank_model_bob_forward(x2, w_t, b_row, batch_tile=8)
    )
    ref2 = x2 @ weight.T + bias
    assert out2.shape == (B2, OUT), out2.shape
    assert jnp.allclose(out2, ref2, atol=1e-5, rtol=1e-5), "mismatch vs reference (B=24)"

    # Case 3: batch not a multiple of the tile (trailing partial block, no pad pass).
    B3 = 20
    x3 = jax.random.normal(k_x3, (B3, IN), jnp.float32)
    out3 = jax.block_until_ready(
        bank_model_bob_forward(x3, w_t, b_row, batch_tile=8)
    )
    ref3 = x3 @ weight.T + bias
    assert out3.shape == (B3, OUT), out3.shape
    assert jnp.allclose(out3, ref3, atol=1e-5, rtol=1e-5), "mismatch vs reference (B=20)"

    print("KERNEL_OK")
</pallas_src>

<mosaic_0001>
module attributes {stable_mosaic.version = 11 : i64} {
  func.func @linear_kernel(%arg0: i32, %arg1: memref<8x12xf32, #tpu.memory_space<vmem>>, %arg2: memref<12x30xf32, #tpu.memory_space<vmem>>, %arg3: memref<1x30xf32, #tpu.memory_space<vmem>>, %arg4: memref<8x30xf32, #tpu.memory_space<vmem>>) attributes {dimension_semantics = [#tpu.dimension_semantics<parallel>], iteration_bounds = array<i64: 1>, scalar_prefetch = 0 : i64, scratch_operands = 0 : i64, tpu.core_type = #tpu.core_type<tc>, window_params = [{transform_indices = @transform_0, window_bounds = array<i64: 8, 12>}, {pipeline_mode = #tpu.pipeline_mode<synchronous>, transform_indices = @transform_1, window_bounds = array<i64: 12, 30>}, {pipeline_mode = #tpu.pipeline_mode<synchronous>, transform_indices = @transform_2, window_bounds = array<i64: 1, 30>}, {transform_indices = @transform_3, window_bounds = array<i64: 8, 30>}]} {
    %c0 = arith.constant 0 : index
    %c0_0 = arith.constant 0 : index
    %0 = vector.load %arg1[%c0, %c0_0] : memref<8x12xf32, #tpu.memory_space<vmem>>, vector<8x12xf32>
    %c0_1 = arith.constant 0 : index
    %c0_2 = arith.constant 0 : index
    %1 = vector.load %arg2[%c0_1, %c0_2] : memref<12x30xf32, #tpu.memory_space<vmem>>, vector<12x30xf32>
    %cst = arith.constant dense<0.000000e+00> : vector<8x30xf32>
    %2 = tpu.matmul %0, %1, %cst {dimension_numbers = #tpu.dot_dimension_numbers<[1], [0], [0], [1], [0, 0, 1, 1], [], []>} : vector<8x12xf32>, vector<12x30xf32>, vector<8x30xf32> -> vector<8x30xf32>
    %c0_3 = arith.constant 0 : index
    %c0_4 = arith.constant 0 : index
    %3 = vector.load %arg3[%c0_3, %c0_4] : memref<1x30xf32, #tpu.memory_space<vmem>>, vector<1x30xf32>
    %4 = vector.broadcast %3 : vector<1x30xf32> to vector<8x30xf32>
    %5 = arith.addf %2, %4 : vector<8x30xf32>
    %c0_5 = arith.constant 0 : index
    %c0_6 = arith.constant 0 : index
    %6 = vector.load %arg4[%c0_5, %c0_6] : memref<8x30xf32, #tpu.memory_space<vmem>>, vector<8x30xf32>
    tpu.vector_store %arg4[%c0_5, %c0_6], %5 {strides = array<i32>} : memref<8x30xf32, #tpu.memory_space<vmem>>, vector<8x30xf32>,
    return
  }
  func.func @transform_0(%arg0: i32) -> (i32, i32) {
    %c0_i32 = arith.constant 0 : i32
    %c0_i32_0 = arith.constant 0 : i32
    return %arg0, %c0_i32 : i32, i32
  }
  func.func @transform_1(%arg0: i32) -> (i32, i32) {
    %c0_i32 = arith.constant 0 : i32
    %c0_i32_0 = arith.constant 0 : i32
    %c0_i32_1 = arith.constant 0 : i32
    return %c0_i32, %c0_i32_0 : i32, i32
  }
  func.func @transform_2(%arg0: i32) -> (i32, i32) {
    %c0_i32 = arith.constant 0 : i32
    %c0_i32_0 = arith.constant 0 : i32
    %c0_i32_1 = arith.constant 0 : i32
    return %c0_i32, %c0_i32_0 : i32, i32
  }
  func.func @transform_3(%arg0: i32) -> (i32, i32) {
    %c0_i32 = arith.constant 0 : i32
    %c0_i32_0 = arith.constant 0 : i32
    return %arg0, %c0_i32 : i32, i32
  }
}

</mosaic_0001>

<bundles_post_ra>
// kernel: tpu_custom_call.1
= control target key start
LH: loop header
LB: loop body
LE: loop exit
PB: predicated region body
PF: predicated region fallthrough
CT: control target
= control target key end

     0   :  { %8 = vsyncpa [#allocation3], 0  ;;  %s223_s0 = inlined_call_operand.hbm [shape: f32[8,12], index: 0, kind: input, shape index: {}]   ;;  %s224_s1 = inlined_call_operand.hbm [shape: f32[12,30], index: 1, kind: input, shape index: {}]   ;;  %s225_s2 = inlined_call_operand.vmem [shape: f32[1,30], index: 2, kind: input, shape index: {}]   ;;  %s226_s3 = inlined_call_operand.hbm [shape: f32[8,30], index: 3, kind: output, shape index: {}]  }
   0x1   :  { %9 = vsyncpa [#allocation6], 0 }
   0x2   :  { %10 = vsyncpa [#allocation4], 0  ;;  %s16_s14 = sshll.u32 %s223_s0, 4  ;;  %s186_s15 = smov [#allocation2]   ;;  %s17_s14 = int_to_ptr.hbm [resolvable:$true] %s16_s14 }
   0x3   :  { %s18_s16 = sshll.u32 %s186_s15, 4  ;;  %s26_s19 = sshll.u32 %s224_s1, 4  ;;  %s19_s16 = int_to_ptr.vmem [resolvable:$true] %s18_s16  ;;  %s27_s19 = int_to_ptr.hbm [resolvable:$true] %s26_s19 }
   0x4   :  { %21 = dma.hbm_to_vmem [thread:$0]  %s17_s14, 128, %s19_s16, [#allocation3]  }
   0x5   :  { %s187_s20 = smov [#allocation5]   ;;  %s188_s22 = smov 128  }
   0x6   :  { %s28_s21 = sshll.u32 %s187_s20, 4  ;;  %s189_s23 = smov 8   ;;  %s29_s21 = int_to_ptr.vmem [resolvable:$true] %s28_s21 }
   0x7   :  { %34 = dma.hbm_to_vmem [thread:$0]  %s27_s19, 256, %s29_s21, [#allocation6], %s188_s22, %s188_s22, %s189_s23  }
   0x8   :  { %180 = dma.done.wait [#allocation3], 128  }
   0x9   :  { %181 = vsyncadd [#allocation3], 4294967168 }
   0xa   :  { %182 = dma.done.wait [#allocation6], 256  }
   0xb   :  { %183 = vsyncadd [#allocation6], 4294967040  ;;  %vm56_vm0 = vcmask 1043456   ;;  %v47_v0 = vld [vmem:[#allocation5 + $0x8] sm:$0xf]  ;;  %v46_v1 = vld [vmem:[#allocation5] sm:$0xff] }
   0xc   :  { %100 = vmatpush.msk.msra.mxu0 %vm56_vm0, %v47_v0  ;;  %v45_v2 = vld [vmem:[#allocation2] sm:$0xff]  ;;  %vm52_vm1 = vcmask 97280   ;;  %s190_s24 = smov [#allocation7]   ;;  %s89_s28 = sshll.u32 %s226_s3, 4  ;;  %vm80_vm2 = vcmask 244736   ;;  %s90_s28 = int_to_ptr.hbm [resolvable:$true] %s89_s28 }
   0xd   :  { %v107_v3 = vld [vmem:[%s225_s2] ss:$0 sm:$0xff]  ;;  %s87_s25 = sshll.u32 %s190_s24, 4  ;;  %s88_s25 = int_to_ptr.vmem [resolvable:$true] %s87_s25 }
   0xe   :  { %75 = vmatpush.msra.mxu0 %v46_v1 }
   0xf   :  { %101 = vmatmul.msk.f32.vlgmr.msra.gmra.mxu0 %vm52_vm1, %v45_v2 }
  0x8c   :  { %v77_v4 = vpop.f32.mrf.mxu0 }
  0x8d   :  { %v78_v5 = vadd.f32 %v107_v3, %v77_v4 }
  0x8f   :  { %81 = vst.msk [vmem:[#allocation7] sm:$0xff] %vm80_vm2, %v78_v5 }
  0x90   :  { %92 = dma.vmem_to_hbm [thread:$0]  %s88_s25, 128, %s90_s28, [#allocation4]  }
  0x91   :  { %184 = dma.done.wait [#allocation4], 128  }
  0x92   :  { %185 = vsyncadd [#allocation4], 4294967168 }
  0x93   :  { %97 = vsyncpa [#allocation3], 1 }
  0x94   :  { %98 = vsyncpa [#allocation6], 1 }
  0x95   :  { %99 = vsyncpa [#allocation4], 1 }

</bundles_post_ra>
